<compile_context>
chip_gen: v6e
topology: v6e:2x2x1
jax: 0.10.0
libtpu: 0.0.40
codegen_flags: <defaults>
</compile_context>

<pallas_src>
import functools

import jax
import jax.numpy as jnp
import numpy as np
from jax.experimental import pallas as pl
from jax.experimental.pallas import tpu as pltpu


def _round_up(a, b):
    return (a + b - 1) // b * b


def _cb_focal_kernel(x_ref, tgt_ref, *rest, gamma, n_true, tiles_per_core,
                     has_weight):
    """One batch tile: per-sample CE -> focal modulation -> per-slot running sum."""
    if has_weight:
        w_ref, o_ref = rest
    else:
        (o_ref,) = rest

    p = pl.program_id(0)   # partial-sum slot ("parallel" -> one per TC on v7x)
    i = pl.program_id(1)   # batch-tile index within this slot ("arbitrary")

    # Init this slot's resident accumulator on its first inner step.
    @pl.when(i == 0)
    def _init():
        o_ref[...] = jnp.zeros_like(o_ref)

    x = x_ref[...].astype(jnp.float32)           # (TN, C), upcast in VMEM
    tgt = tgt_ref[...]                           # (TN, 1) i32 class ids
    tn, c = x.shape

    cls_ids = jax.lax.broadcasted_iota(jnp.int32, (tn, c), 1)
    one_hot = cls_ids == tgt                     # (TN, C) bool

    # Numerically stable cross-entropy on the shifted logits (mx cancels):
    #   ce = log(sum(exp(x - mx))) - (x[tgt] - mx)
    mx = jnp.max(x, axis=1, keepdims=True)                                # (TN, 1)
    xm = x - mx                                                           # (TN, C)
    # TODO(synk): for C << 128 the lane reductions below use only ~C/128 of each
    # vreg; if bundle dumps show VPU/XLU saturation, fold 128//C samples per lane
    # row with segmented roll+add instead of padding C (padding would 8x HBM
    # traffic on this memory-bound kernel).
    sum_exp = jnp.sum(jnp.exp(xm), axis=1, keepdims=True)                 # (TN, 1)
    tgt_shift = jnp.sum(jnp.where(one_hot, xm, 0.0), axis=1, keepdims=True)
    ce = jnp.log(sum_exp) - tgt_shift                                     # (TN, 1)

    if has_weight:
        # Per-sample weight w[target], pre-gathered in the wrapper.
        ce = ce * w_ref[...]

    # focal_loss: (1 - p)**gamma * ce with p = exp(-ce); gamma is static and the
    # module default gamma == 0 skips the extra EUP work entirely.
    # TODO(synk): if the single EUP becomes the binding slot on v6e/v7x, the
    # softmax exp above could use the bf16 EUP path (keep f32 on v5e).
    if gamma == 0.0:
        focal = ce
    else:
        pe = jnp.exp(-ce)
        focal = (1.0 - pe) ** gamma * ce

    # Mask rows past the true batch size (partial last tile, and the clamped
    # duplicate tile when the tile count does not split evenly across slots).
    tile_idx = p * tiles_per_core + i
    row = tile_idx * tn + jax.lax.broadcasted_iota(jnp.int32, (tn, 1), 0)
    focal = jnp.where(row < n_true, focal, 0.0)

    # Every element of the slot's (8, 128) accumulator tile holds the running sum.
    o_ref[...] += jnp.sum(focal)


def cb_focal_loss(x, target, gamma=0.0, weight=None, tile_n=None):
    """CBFocalLoss.forward — x: (N, C) logits, target: (N,) int. Scalar f32 loss."""
    assert gamma >= 0
    n, c = x.shape
    itemsize = jnp.dtype(x.dtype).itemsize
    # Min sublane multiple for the logits dtype: 8 (f32), 16 (bf16), 32 (int8).
    sublane = max(8, 32 // max(itemsize, 1))

    # Gen-keyed VMEM budget: ~48 MiB on v7x (64 MiB physical), 64 MiB on v5e/v6e.
    try:
        vmem_cap = int(pltpu.get_tpu_info().vmem_capacity_bytes)
    except Exception:  # conservative fallback = v7x physical capacity
        vmem_cap = 64 * 1024 * 1024
    vmem_limit = max(32 * 1024 * 1024, min(vmem_cap * 3 // 4, 64 * 1024 * 1024))

    # Actual VMEM bytes per logits row: lanes pad to 128 regardless of C.
    row_bytes = itemsize * _round_up(c, 128)
    if tile_n is None:
        # Multi-MiB tiles amortize the ~0.35 us per-grid-step overhead; x is
        # double-buffered by the pipeline so keep 2 tiles well under the limit.
        per_buf_budget = min(16 * 1024 * 1024, vmem_limit // 4)
        tile_n = max(sublane, per_buf_budget // row_bytes)
    tile_n = _round_up(min(int(tile_n), _round_up(n, sublane)), sublane)

    num_tiles = pl.cdiv(n, tile_n)
    # Leading "parallel" axis: 2 partial sums so v7x's two TensorCores each own
    # roughly half of the batch tiles; harmless (sequential) on 1-TC chips.
    num_partials = 2 if num_tiles > 1 else 1
    tiles_per_core = pl.cdiv(num_tiles, num_partials)

    def row_block(i_p, i_t):
        # Clamp so an odd tile count never produces an out-of-bounds block; the
        # duplicated tile is masked off via the logical row index in the kernel.
        return jnp.minimum(i_p * tiles_per_core + i_t, num_tiles - 1)

    tgt2d = target.astype(jnp.int32).reshape(n, 1)

    has_weight = weight is not None
    in_specs = [
        pl.BlockSpec((tile_n, c), lambda p, i: (row_block(p, i), 0)),   # logits
        pl.BlockSpec((tile_n, 1), lambda p, i: (row_block(p, i), 0)),   # targets
    ]
    args = [x, tgt2d]
    if has_weight:
        # Per-sample weight w[target]: tiny XLA gather here instead of a (TN, C)
        # select + lane reduction per tile inside the kernel.
        w_t = jnp.asarray(weight, dtype=jnp.float32).reshape(c)[
            target.astype(jnp.int32)].reshape(n, 1)
        in_specs.append(pl.BlockSpec((tile_n, 1), lambda p, i: (row_block(p, i), 0)))
        args.append(w_t)

    kernel = functools.partial(
        _cb_focal_kernel, gamma=float(gamma), n_true=int(n),
        tiles_per_core=int(tiles_per_core), has_weight=has_weight)

    out = pl.pallas_call(
        kernel,
        out_shape=jax.ShapeDtypeStruct((8 * num_partials, 128), jnp.float32),
        grid=(num_partials, tiles_per_core),
        in_specs=in_specs,
        out_specs=pl.BlockSpec((8, 128), lambda p, i: (p, 0)),
        compiler_params=pltpu.CompilerParams(
            dimension_semantics=("parallel", "arbitrary"),
            vmem_limit_bytes=int(vmem_limit),
        ),
    )(*args)

    partials = out[::8, 0]          # one running sum per partial-sum slot
    return jnp.sum(partials) / n    # plain .mean() over the true batch size


def _cb_focal_ref(x, target, gamma=0.0, weight=None):
    """Pure-JAX reference matching the PyTorch CBFocalLoss forward."""
    n, c = x.shape
    logp = jax.nn.log_softmax(x.astype(jnp.float32), axis=-1)
    ce = -jnp.take_along_axis(logp, target.reshape(n, 1).astype(jnp.int32), axis=1)[:, 0]
    if weight is not None:
        ce = ce * jnp.asarray(weight, dtype=jnp.float32)[target]
    p = jnp.exp(-ce)
    return jnp.mean((1.0 - p) ** gamma * ce)


if __name__ == "__main__":
    key = jax.random.PRNGKey(0)
    kx, kt, kx2, kt2 = jax.random.split(key, 4)

    # 1) Module defaults: gamma=0.0, weight=None (plain mean cross-entropy).
    N, C = 8, 16
    x = jax.random.normal(kx, (N, C), dtype=jnp.float32)
    target = jax.random.randint(kt, (N,), 0, C, dtype=jnp.int32)
    out0 = jax.block_until_ready(cb_focal_loss(x, target, gamma=0.0))
    ref0 = _cb_focal_ref(x, target, gamma=0.0)
    np.testing.assert_allclose(np.asarray(out0), np.asarray(ref0),
                               rtol=1e-5, atol=1e-5)

    # 2) Focal modulation + class-balanced per-class weights.
    w = jnp.asarray(np.linspace(0.5, 1.5, C), dtype=jnp.float32)
    out1 = jax.block_until_ready(cb_focal_loss(x, target, gamma=2.0, weight=w))
    ref1 = _cb_focal_ref(x, target, gamma=2.0, weight=w)
    np.testing.assert_allclose(np.asarray(out1), np.asarray(ref1),
                               rtol=1e-5, atol=1e-5)

    # 3) Multi-tile / dual-partial path (odd tile count + partial last tile) with
    #    native bf16 logits (no wrapper f32 copy, halved HBM traffic).
    N2, C2 = 100, 16
    x2 = jax.random.normal(kx2, (N2, C2), dtype=jnp.float32).astype(jnp.bfloat16)
    t2 = jax.random.randint(kt2, (N2,), 0, C2, dtype=jnp.int32)
    out2 = jax.block_until_ready(
        cb_focal_loss(x2, t2, gamma=1.0, weight=w, tile_n=16))
    ref2 = _cb_focal_ref(x2.astype(jnp.float32), t2, gamma=1.0, weight=w)
    np.testing.assert_allclose(np.asarray(out2), np.asarray(ref2),
                               rtol=1e-4, atol=1e-4)

    print("KERNEL_OK")
</pallas_src>

<mosaic_0001>
module attributes {stable_mosaic.version = 11 : i64} {
  func.func @_cb_focal_kernel(%arg0: i32, %arg1: i32, %arg2: memref<8x16xf32, #tpu.memory_space<vmem>>, %arg3: memref<8x1xi32, #tpu.memory_space<vmem>>, %arg4: memref<8x128xf32, #tpu.memory_space<vmem>>) attributes {dimension_semantics = [#tpu.dimension_semantics<parallel>, #tpu.dimension_semantics<arbitrary>], iteration_bounds = array<i64: 1, 1>, scalar_prefetch = 0 : i64, scratch_operands = 0 : i64, tpu.core_type = #tpu.core_type<tc>, window_params = [{transform_indices = @transform_0, window_bounds = array<i64: 8, 16>}, {transform_indices = @transform_1, window_bounds = array<i64: 8, 1>}, {transform_indices = @transform_2, window_bounds = array<i64: 8, 128>}]} {
    %c0_i32 = arith.constant 0 : i32
    %0 = arith.cmpi eq, %arg1, %c0_i32 : i32
    %1 = arith.extui %0 : i1 to i32
    %c0_i32_0 = arith.constant 0 : i32
    %2 = arith.cmpi ne, %1, %c0_i32_0 : i32
    scf.if %2 {
      %cst_14 = arith.constant 0.000000e+00 : f32
      %39 = vector.broadcast %cst_14 : f32 to vector<8x128xf32>
      %c0_15 = arith.constant 0 : index
      %c0_16 = arith.constant 0 : index
      %40 = vector.load %arg4[%c0_15, %c0_16] : memref<8x128xf32, #tpu.memory_space<vmem>>, vector<8x128xf32>
      tpu.vector_store %arg4[%c0_15, %c0_16], %39 {strides = array<i32>} : memref<8x128xf32, #tpu.memory_space<vmem>>, vector<8x128xf32>,
    } else {
    }
    %c0 = arith.constant 0 : index
    %c0_1 = arith.constant 0 : index
    %3 = vector.load %arg2[%c0, %c0_1] : memref<8x16xf32, #tpu.memory_space<vmem>>, vector<8x16xf32>
    %c0_2 = arith.constant 0 : index
    %c0_3 = arith.constant 0 : index
    %4 = vector.load %arg3[%c0_2, %c0_3] : memref<8x1xi32, #tpu.memory_space<vmem>>, vector<8x1xi32>
    %5 = tpu.iota {dimensions = array<i32: 1>} : vector<8x16xi32>
    %6 = vector.broadcast %4 : vector<8x1xi32> to vector<8x16xi32>
    %7 = arith.cmpi eq, %5, %6 : vector<8x16xi32>
    %cst = arith.constant dense<0xFF800000> : vector<8xf32>
    %8 = vector.multi_reduction <maximumf>, %3, %cst [1] : vector<8x16xf32> to vector<8xf32>
    %9 = vector.shape_cast %8 : vector<8xf32> to vector<8x1xf32>
    %10 = vector.broadcast %9 : vector<8x1xf32> to vector<8x16xf32>
    %11 = arith.subf %3, %10 : vector<8x16xf32>
    %12 = math.exp %11 : vector<8x16xf32>
    %cst_4 = arith.constant dense<0.000000e+00> : vector<8xf32>
    %13 = vector.multi_reduction <add>, %12, %cst_4 [1] : vector<8x16xf32> to vector<8xf32>
    %14 = vector.shape_cast %13 : vector<8xf32> to vector<8x1xf32>
    %cst_5 = arith.constant 0.000000e+00 : f32
    %15 = vector.broadcast %cst_5 : f32 to vector<8x16xf32>
    %16 = arith.select %7, %11, %15 : vector<8x16xi1>, vector<8x16xf32>
    %cst_6 = arith.constant dense<0.000000e+00> : vector<8xf32>
    %17 = vector.multi_reduction <add>, %16, %cst_6 [1] : vector<8x16xf32> to vector<8xf32>
    %18 = vector.shape_cast %17 : vector<8xf32> to vector<8x1xf32>
    %19 = math.log %14 : vector<8x1xf32>
    %20 = arith.subf %19, %18 : vector<8x1xf32>
    %c1_i32 = arith.constant 1 : i32
    %21 = arith.muli %arg0, %c1_i32 : i32
    %22 = arith.addi %21, %arg1 : i32
    %c8_i32 = arith.constant 8 : i32
    %23 = arith.muli %22, %c8_i32 : i32
    %24 = tpu.iota {dimensions = array<i32: 0>} : vector<8x1xi32>
    %25 = vector.broadcast %23 : i32 to vector<8x1xi32>
    %26 = arith.addi %25, %24 : vector<8x1xi32>
    %c8_i32_7 = arith.constant 8 : i32
    %27 = vector.broadcast %c8_i32_7 : i32 to vector<8x1xi32>
    %28 = arith.cmpi slt, %26, %27 : vector<8x1xi32>
    %cst_8 = arith.constant 0.000000e+00 : f32
    %29 = vector.broadcast %cst_8 : f32 to vector<8x1xf32>
    %30 = arith.select %28, %20, %29 : vector<8x1xi1>, vector<8x1xf32>
    %c0_9 = arith.constant 0 : index
    %c0_10 = arith.constant 0 : index
    %31 = vector.load %arg4[%c0_9, %c0_10] : memref<8x128xf32, #tpu.memory_space<vmem>>, vector<8x128xf32>
    %32 = vector.shape_cast %30 : vector<8x1xf32> to vector<1x8x1xf32>
    %cst_11 = arith.constant dense<0.000000e+00> : vector<1xf32>
    %33 = vector.multi_reduction <add>, %32, %cst_11 [1, 2] : vector<1x8x1xf32> to vector<1xf32>
    %34 = vector.shape_cast %33 : vector<1xf32> to vector<1x1x1xf32>
    %35 = vector.extract %34[0, 0, 0] : f32 from vector<1x1x1xf32>
    %36 = vector.broadcast %35 : f32 to vector<8x128xf32>
    %37 = arith.addf %31, %36 : vector<8x128xf32>
    %c0_12 = arith.constant 0 : index
    %c0_13 = arith.constant 0 : index
    %38 = vector.load %arg4[%c0_12, %c0_13] : memref<8x128xf32, #tpu.memory_space<vmem>>, vector<8x128xf32>
    tpu.vector_store %arg4[%c0_12, %c0_13], %37 {strides = array<i32>} : memref<8x128xf32, #tpu.memory_space<vmem>>, vector<8x128xf32>,
    return
  }
  func.func @transform_0(%arg0: i32, %arg1: i32) -> (i32, i32) {
    %c1_i32 = arith.constant 1 : i32
    %0 = arith.muli %arg0, %c1_i32 : i32
    %1 = arith.addi %0, %arg1 : i32
    %c0_i32 = arith.constant 0 : i32
    %2 = arith.minsi %1, %c0_i32 : i32
    %c0_i32_0 = arith.constant 0 : i32
    %c0_i32_1 = arith.constant 0 : i32
    return %2, %c0_i32_0 : i32, i32
  }
  func.func @transform_1(%arg0: i32, %arg1: i32) -> (i32, i32) {
    %c1_i32 = arith.constant 1 : i32
    %0 = arith.muli %arg0, %c1_i32 : i32
    %1 = arith.addi %0, %arg1 : i32
    %c0_i32 = arith.constant 0 : i32
    %2 = arith.minsi %1, %c0_i32 : i32
    %c0_i32_0 = arith.constant 0 : i32
    %c0_i32_1 = arith.constant 0 : i32
    return %2, %c0_i32_0 : i32, i32
  }
  func.func @transform_2(%arg0: i32, %arg1: i32) -> (i32, i32) {
    %c0_i32 = arith.constant 0 : i32
    %c0_i32_0 = arith.constant 0 : i32
    return %arg0, %c0_i32 : i32, i32
  }
}

</mosaic_0001>

<bundles_post_ra>
// kernel: tpu_custom_call.1
= control target key start
LH: loop header
LB: loop body
LE: loop exit
PB: predicated region body
PF: predicated region fallthrough
CT: control target
= control target key end

     0   :  { %vm79_vm0 = vcmask 130048   ;;  %s206_s0 = inlined_call_operand.vmem [shape: f32[8,16], index: 0, kind: input, shape index: {}]   ;;  %s207_s1 = inlined_call_operand.vmem [shape: s32[8,1], index: 1, kind: input, shape index: {}]   ;;  %s208_s2 = inlined_call_operand.hbm [shape: f32[8,128], index: 2, kind: output, shape index: {}]  }
   0x1   :  { %v71_v0 = vld [vmem:[%s206_s0] sm:$0xff] }
   0x2   :  { %7 = vsyncpa [#allocation3], 0  ;;  %v80_v1 = vsel %vm79_vm0, %v71_v0, -inf  ;;  %v177_v2 = vmov 0   ;;  %v72_v3 = vld [vmem:[%s207_s1] sm:$0xff]  ;;  %v73_v7 = vlaneseq  ;;  %vm105_vm2 = vcmask 7168  }
   0x3   :  { %150 = vset.pattern.permute.xlu0 %v177_v2  ;;  %s178_s0 = smov [#allocation2]  }
   0x4   :  { %81 = vmax.xlane.f32.xlu0 %v80_v1  ;;  %v74_v8 = vand.u32 127, %v73_v7  ;;  %s125_s1 = sshll.u32 %s178_s0, 4  ;;  %s126_s1 = int_to_ptr.vmem [resolvable:$true] %s125_s1 }
   0x5   :  { %s155_s14 = scalar_lea.vmem %s126_s1, 128  ;;  %p160_p1 = scmp.lt.s32.totalorder %s126_s1, %s126_s1 }
   0x6   :  { %p156_p0 = scmp.ne.s32.totalorder %s126_s1, %s155_s14  ;;  %p161_p2 = scmp.lt.s32.totalorder %s155_s14, %s155_s14 }
   0x8   :  { %p162_p3 = por %p161_p2, %p160_p1 }
   0xa   :  { %p163_p4 = pnand %p162_p3, %p156_p0 }
  0x1a   :  { %76 = vperm.xlu0 %150, %v72_v3  }
  0x8d   :  { %v82_v4 = vpop.xlane.xlu0 %81 }
  0x8e   :  { %v83_v5 = vsub.f32 %v71_v0, %v82_v4 }
  0x90   :  { %v84_v6 = vmul.f32 1.442695, %v83_v5 }
  0x92   :  { %151 = vpow2.f32 %v84_v6 }
  0x95   :  { %v77_v9 = vpop.permute.xlu0 %76 }
  0x96   :  { %vm78_vm1 = vcmp.eq.s32.totalorder %v74_v8, %v77_v9 }
  0x97   :  { %v89_v12 = vsel %vm78_vm1, %v83_v5, 0.0 }
  0x98   :  { %v90_v13 = vsel %vm79_vm0, %v89_v12, 0.0 }
  0x9f   :  { %v152_v10 = vpop.eup %151 }
  0xa0   :  { %v86_v11 = vsel %vm79_vm0, %v152_v10, 0.0 }
  0xa1   :  { %87 = vadd.xlane.f32.xlu1 %v86_v11 }
  0xa5   :  { %91 = vadd.xlane.f32.xlu1 %v90_v13 }
 0x12a   :  { %v88_v14 = vpop.xlane.xlu1 %87 }
 0x12b   :  { %153 = vlog2.f32 %v88_v14 }
 0x12e   :  { %v92_v17 = vpop.xlane.xlu1 %91 }
 0x138   :  { %v154_v15 = vpop.eup %153 }
 0x139   :  { %v94_v16 = vmul.f32 0.6931472, %v154_v15 }
 0x13b   :  { %v95_v18 = vsub.f32 %v94_v16, %v92_v17 }
 0x13d   :  { %v106_v19 = vsel %vm105_vm2, %v95_v18, 0.0 }
 0x13e   :  { %107 = vadd.xlane.f32.xlu1 %v106_v19 }
 0x1c7   :  { %v108_v20 = vpop.xlane.xlu1 %107 }
 0x1c8   :  { %v109_v21 = vrot.slane %v108_v20, 4 }
 0x1ca   :  { %v110_v22 = vadd.f32 %v109_v21, %v108_v20 }
 0x1cc   :  { %v111_v23 = vrot.slane %v110_v22, 2 }
 0x1ce   :  { %v112_v24 = vadd.f32 %v111_v23, %v110_v22 }
 0x1d0   :  { %v113_v25 = vrot.slane %v112_v24, 1 }
 0x1d2   :  { %v114_v26 = vadd.f32 %v113_v25, %v112_v24 }
 0x1d4   :  { %145 = vpush %v114_v26 }
 0x205   :  { %s146_s13 = spop %145 }
 0x206   :  { %v116_v27 = vstv %s146_s13 }
 0x207   :  { %118 = vst [vmem:[#allocation2] sm:$0xff] %v116_v27 }
 0x208   :  { %166 = shalt.err (!%p163_p4)
}
 0x209   :  { %128 = dma.vmem_to_hbm [thread:$0]  %s126_s1, 128, %s208_s2, [#allocation3]  }
 0x20a   :  { %175 = dma.done.wait [#allocation3], 128  }
 0x20b   :  { %176 = vsyncadd [#allocation3], 4294967168 }
 0x20c   :  { %132 = vsyncpa [#allocation3], 1 }

</bundles_post_ra>
